<compile_context>
chip_gen: v7x
topology: tpu7x:2x2x1
jax: 0.10.0
libtpu: 0.0.40
codegen_flags: <defaults>
</compile_context>

<pallas_src>
import functools

import jax
import jax.numpy as jnp
from jax import lax
from jax.experimental import pallas as pl
from jax.experimental.pallas import tpu as pltpu


def _round_up(x, m):
    return ((x + m - 1) // m) * m


def _cdiv(a, b):
    return (a + b - 1) // b


# ----------------------------- Pallas kernels ------------------------------ #
def _kernel_single_k(a_ref, b_ref, bias_ref, o_ref, *, activation):
    """K fits in one tile: dot + bias + SiLU, store directly (no scratch).

    a_ref:    (tile_m, K_pad)   bf16 im2col patches
    b_ref:    (K_pad, tile_n)   bf16 weight with BN scale folded in
    bias_ref: (1, tile_n)       f32 folded BN bias
    o_ref:    (tile_m, tile_n)  output
    """
    y = jnp.dot(a_ref[...], b_ref[...], preferred_element_type=jnp.float32)
    y = y + bias_ref[...]
    if activation:
        y = y * jax.nn.sigmoid(y)          # SiLU: sigmoid on EUP, mul on VPU
    o_ref[...] = y.astype(o_ref.dtype)


def _kernel_multi_k(a_ref, b_ref, bias_ref, o_ref, acc_ref, *, activation):
    """Large K: accumulate over the (last, 'arbitrary') k grid axis in f32 VMEM."""
    k = pl.program_id(2)

    @pl.when(k == 0)
    def _():
        acc_ref[...] = jnp.zeros_like(acc_ref)

    acc_ref[...] += jnp.dot(a_ref[...], b_ref[...],
                            preferred_element_type=jnp.float32)

    @pl.when(k == pl.num_programs(2) - 1)
    def _():
        y = acc_ref[...] + bias_ref[...]
        if activation:
            y = y * jax.nn.sigmoid(y)
        o_ref[...] = y.astype(o_ref.dtype)


# ------------------------- fused GEMM + epilogue ---------------------------- #
_VMEM_BUDGET = 26 * 1024 * 1024   # double-buffered working-set budget (v7x-safe)


def _fused_matmul_bias_silu(a, b, bias, *, activation=True, out_dtype=jnp.float32):
    """a: (M, K) bf16 patches, b: (K, OC) bf16 scale-folded weight, bias: (OC,) f32."""
    M, K = a.shape
    OC = b.shape[1]
    out_bytes = jnp.dtype(out_dtype).itemsize

    # ---- tile selection (lane-dense, MXU-friendly, balanced) ----
    OC_pad = _round_up(OC, 128)
    tile_n = min(OC_pad, 512)                      # >=128, lane-dense unmasked vst
    num_n = OC_pad // tile_n

    K128 = _round_up(K, 128)
    max_tile_k = 2048                              # keep whole K resident when it fits
    num_k = _cdiv(K128, max_tile_k)
    tile_k = _round_up(_cdiv(K128, num_k), 128)
    K_pad = tile_k * num_k

    def _working_set(tm):
        ws = 2 * (tm * tile_k + tile_k * tile_n) * 2    # bf16 A/B, double-buffered
        ws += 2 * tm * tile_n * out_bytes               # output double buffer
        if num_k > 1:
            ws += tm * tile_n * 4                       # f32 accumulator scratch
        return ws

    target_m = 1024 if num_k == 1 else 512
    while target_m > 128 and _working_set(target_m) > _VMEM_BUDGET:
        target_m //= 2
    num_m = max(_cdiv(M, target_m), 1)
    if num_n == 1 and num_m == 1 and M >= 32:
        num_m = 2                                  # >=2 parallel tiles for megacore
    tile_m = _round_up(_cdiv(M, num_m), 16)        # bf16 sublane packing
    M_pad = tile_m * num_m

    # ---- zero padding (exact for the matmul; padded cols sliced off) ----
    a_p = jnp.pad(a.astype(jnp.bfloat16), ((0, M_pad - M), (0, K_pad - K)))
    b_p = jnp.pad(b.astype(jnp.bfloat16), ((0, K_pad - K), (0, OC_pad - OC)))
    bias_p = jnp.pad(bias.astype(jnp.float32), (0, OC_pad - OC)).reshape(1, OC_pad)

    cost = pl.CostEstimate(
        flops=2 * M_pad * K_pad * OC_pad,
        transcendentals=M_pad * OC_pad if activation else 0,
        bytes_accessed=(a_p.size * 2 * num_n          # A re-read once per n tile
                        + b_p.size * 2 * num_m        # B re-read once per m tile
                        + bias_p.size * 4 * num_m
                        + M_pad * OC_pad * out_bytes),
    )

    if num_k == 1:
        grid = (num_m, num_n)
        kernel = functools.partial(_kernel_single_k, activation=activation)
        in_specs = [
            pl.BlockSpec((tile_m, tile_k), lambda i, j: (i, 0)),   # patches
            pl.BlockSpec((tile_k, tile_n), lambda i, j: (0, j)),   # folded weight
            pl.BlockSpec((1, tile_n), lambda i, j: (0, j)),        # BN bias
        ]
        out_spec = pl.BlockSpec((tile_m, tile_n), lambda i, j: (i, j))
        scratch = []
        dims = ("parallel", "parallel")
    else:
        grid = (num_m, num_n, num_k)
        kernel = functools.partial(_kernel_multi_k, activation=activation)
        in_specs = [
            pl.BlockSpec((tile_m, tile_k), lambda i, j, k: (i, k)),
            pl.BlockSpec((tile_k, tile_n), lambda i, j, k: (k, j)),
            pl.BlockSpec((1, tile_n), lambda i, j, k: (0, j)),
        ]
        out_spec = pl.BlockSpec((tile_m, tile_n), lambda i, j, k: (i, j))
        scratch = [pltpu.VMEM((tile_m, tile_n), jnp.float32)]
        dims = ("parallel", "parallel", "arbitrary")

    out = pl.pallas_call(
        kernel,
        out_shape=jax.ShapeDtypeStruct((M_pad, OC_pad), out_dtype),
        grid_spec=pltpu.PrefetchScalarGridSpec(
            num_scalar_prefetch=0,
            grid=grid,
            in_specs=in_specs,
            out_specs=out_spec,
            scratch_shapes=scratch,
        ),
        compiler_params=pltpu.CompilerParams(
            dimension_semantics=dims,
            vmem_limit_bytes=32 * 1024 * 1024,   # working set stays <= ~26 MiB
        ),
        cost_estimate=cost,
    )(a_p, b_p, bias_p)
    return out[:M, :OC]


# ------------------------------ glue (JAX) ---------------------------------- #
def _im2col_nhwc(x_nhwc, kh, kw, stride, padding):
    """x: (N, H, W, C) -> patches (N*OH*OW, KH*KW*C); K ordering = (ki, kj, c)."""
    N, H, W, C = x_nhwc.shape
    x_pad = jnp.pad(x_nhwc, ((0, 0), (padding, padding), (padding, padding), (0, 0)))
    OH = (H + 2 * padding - kh) // stride + 1
    OW = (W + 2 * padding - kw) // stride + 1

    cols = []
    for ki in range(kh):
        for kj in range(kw):
            cols.append(lax.slice(
                x_pad,
                (0, ki, kj, 0),
                (N, ki + (OH - 1) * stride + 1, kj + (OW - 1) * stride + 1, C),
                (1, stride, stride, 1)))           # (N, OH, OW, C)
    # Single concatenate on the channel (lane) axis — no stack + 5-D transpose.
    patches = jnp.concatenate(cols, axis=-1).reshape(N * OH * OW, kh * kw * C)
    return patches, OH, OW


def conv_block_forward_nhwc(x_nhwc, params, *, stride=1, padding=0,
                            activation=True, eps=1e-5, out_dtype=None):
    """ConvBlock forward on NHWC input -> NHWC output (preferred for chaining)."""
    w = params["weight"]                              # (OC, C, KH, KW) PyTorch layout
    OC, C, KH, KW = w.shape
    N = x_nhwc.shape[0]
    if out_dtype is None:
        out_dtype = x_nhwc.dtype

    # Cast to bf16 BEFORE im2col: the KH*KW-expanded patch array is half-size in HBM.
    patches, OH, OW = _im2col_nhwc(x_nhwc.astype(jnp.bfloat16), KH, KW, stride, padding)

    inv_std = 1.0 / jnp.sqrt(params["running_var"].astype(jnp.float32) + eps)
    scale = params["gamma"].astype(jnp.float32) * inv_std                 # (OC,)
    bias = (params["beta"].astype(jnp.float32)
            - params["running_mean"].astype(jnp.float32) * scale)         # (OC,)

    # Weight flattened as (KH, KW, C, OC) to match the (ki, kj, c) patch ordering,
    # BN scale folded in f32 first, then cast to bf16 for the MXU.
    w_mat = jnp.transpose(w.astype(jnp.float32), (2, 3, 1, 0)).reshape(KH * KW * C, OC)
    w_mat = (w_mat * scale[None, :]).astype(jnp.bfloat16)

    out = _fused_matmul_bias_silu(patches, w_mat, bias,
                                  activation=activation, out_dtype=out_dtype)
    return out.reshape(N, OH, OW, OC)


def conv_block_forward(x, params, *, stride=1, padding=0, activation=True,
                       eps=1e-5, out_dtype=None):
    """PyTorch-compatible NCHW API.  For stacked ConvBlocks prefer
    conv_block_forward_nhwc (ideally with out_dtype=bf16) to skip the two
    layout transposes and the f32<->bf16 cast passes per layer."""
    x_nhwc = jnp.transpose(x, (0, 2, 3, 1))
    out = conv_block_forward_nhwc(x_nhwc, params, stride=stride, padding=padding,
                                  activation=activation, eps=eps, out_dtype=out_dtype)
    return jnp.transpose(out, (0, 3, 1, 2))


# ------------------------- pure-JAX reference ------------------------------- #
def _reference(x, params, *, stride, padding, activation, eps=1e-5):
    y = lax.conv_general_dilated(
        x, params["weight"],
        window_strides=(stride, stride),
        padding=[(padding, padding), (padding, padding)],
        dimension_numbers=("NCHW", "OIHW", "NCHW"),
    )
    inv_std = 1.0 / jnp.sqrt(params["running_var"] + eps)
    scale = (params["gamma"] * inv_std).reshape(1, -1, 1, 1)
    bias = (params["beta"] - params["running_mean"] * params["gamma"] * inv_std).reshape(1, -1, 1, 1)
    y = y * scale + bias
    if activation:
        y = y * jax.nn.sigmoid(y)
    return y


# --------------------------------- main -------------------------------------- #
if __name__ == "__main__":
    # Small synthetic ConvBlock: in_channels=4, out_channels=8, k=3, stride=1, pad=1
    N, C, H, W = 2, 4, 16, 16
    OC, K = 8, 3
    stride, padding = 1, 1

    key = jax.random.PRNGKey(0)
    k_x, k_w, k_g, k_b, k_m, k_v = jax.random.split(key, 6)

    x = jax.random.normal(k_x, (N, C, H, W), dtype=jnp.float32)
    params = {
        "weight": 0.1 * jax.random.normal(k_w, (OC, C, K, K), dtype=jnp.float32),
        "gamma": 1.0 + 0.1 * jax.random.normal(k_g, (OC,), dtype=jnp.float32),
        "beta": 0.1 * jax.random.normal(k_b, (OC,), dtype=jnp.float32),
        "running_mean": 0.1 * jax.random.normal(k_m, (OC,), dtype=jnp.float32),
        "running_var": jnp.abs(jax.random.normal(k_v, (OC,), dtype=jnp.float32)) + 0.5,
    }

    out = conv_block_forward(x, params, stride=stride, padding=padding, activation=True)
    out = jax.block_until_ready(out)

    ref = _reference(x, params, stride=stride, padding=padding, activation=True)
    assert out.shape == (N, OC, H, W), out.shape
    # bf16 MXU operands / bf16 im2col with f32 accumulation -> relaxed tolerance.
    err = float(jnp.max(jnp.abs(out - ref)))
    assert jnp.allclose(out, ref, atol=5e-2, rtol=5e-2), err

    print("KERNEL_OK")
</pallas_src>

<mosaic_0001>
module attributes {stable_mosaic.version = 11 : i64} {
  func.func @_kernel_single_k(%arg0: i32, %arg1: i32, %arg2: memref<256x128xbf16, #tpu.memory_space<vmem>>, %arg3: memref<128x128xbf16, #tpu.memory_space<vmem>>, %arg4: memref<1x128xf32, #tpu.memory_space<vmem>>, %arg5: memref<256x128xf32, #tpu.memory_space<vmem>>) attributes {dimension_semantics = [#tpu.dimension_semantics<parallel>, #tpu.dimension_semantics<parallel>], iteration_bounds = array<i64: 2, 1>, scalar_prefetch = 0 : i64, scratch_operands = 0 : i64, tpu.core_type = #tpu.core_type<tc>, window_params = [{transform_indices = @transform_0, window_bounds = array<i64: 256, 128>}, {transform_indices = @transform_1, window_bounds = array<i64: 128, 128>}, {transform_indices = @transform_2, window_bounds = array<i64: 1, 128>}, {transform_indices = @transform_3, window_bounds = array<i64: 256, 128>}]} {
    %c0 = arith.constant 0 : index
    %c0_0 = arith.constant 0 : index
    %0 = vector.load %arg2[%c0, %c0_0] : memref<256x128xbf16, #tpu.memory_space<vmem>>, vector<256x128xbf16>
    %c0_1 = arith.constant 0 : index
    %c0_2 = arith.constant 0 : index
    %1 = vector.load %arg3[%c0_1, %c0_2] : memref<128x128xbf16, #tpu.memory_space<vmem>>, vector<128x128xbf16>
    %cst = arith.constant dense<0.000000e+00> : vector<256x128xf32>
    %2 = tpu.matmul %0, %1, %cst {dimension_numbers = #tpu.dot_dimension_numbers<[1], [0], [0], [1], [0, 0, 1, 1], [], []>} : vector<256x128xbf16>, vector<128x128xbf16>, vector<256x128xf32> -> vector<256x128xf32>
    %c0_3 = arith.constant 0 : index
    %c0_4 = arith.constant 0 : index
    %3 = vector.load %arg4[%c0_3, %c0_4] : memref<1x128xf32, #tpu.memory_space<vmem>>, vector<1x128xf32>
    %4 = vector.broadcast %3 : vector<1x128xf32> to vector<256x128xf32>
    %5 = arith.addf %2, %4 : vector<256x128xf32>
    %6 = arith.negf %5 : vector<256x128xf32>
    %7 = math.exp %6 : vector<256x128xf32>
    %cst_5 = arith.constant 1.000000e+00 : f32
    %8 = vector.broadcast %cst_5 : f32 to vector<256x128xf32>
    %9 = arith.addf %8, %7 : vector<256x128xf32>
    %10 = arith.divf %8, %9 : vector<256x128xf32>
    %11 = arith.mulf %5, %10 : vector<256x128xf32>
    %c0_6 = arith.constant 0 : index
    %c0_7 = arith.constant 0 : index
    %12 = vector.load %arg5[%c0_6, %c0_7] : memref<256x128xf32, #tpu.memory_space<vmem>>, vector<256x128xf32>
    tpu.vector_store %arg5[%c0_6, %c0_7], %11 {strides = array<i32>} : memref<256x128xf32, #tpu.memory_space<vmem>>, vector<256x128xf32>,
    return
  }
  func.func @transform_0(%arg0: i32, %arg1: i32) -> (i32, i32) {
    %c0_i32 = arith.constant 0 : i32
    %c0_i32_0 = arith.constant 0 : i32
    return %arg0, %c0_i32 : i32, i32
  }
  func.func @transform_1(%arg0: i32, %arg1: i32) -> (i32, i32) {
    %c0_i32 = arith.constant 0 : i32
    %c0_i32_0 = arith.constant 0 : i32
    return %c0_i32, %arg1 : i32, i32
  }
  func.func @transform_2(%arg0: i32, %arg1: i32) -> (i32, i32) {
    %c0_i32 = arith.constant 0 : i32
    %c0_i32_0 = arith.constant 0 : i32
    return %c0_i32, %arg1 : i32, i32
  }
  func.func @transform_3(%arg0: i32, %arg1: i32) -> (i32, i32) {
    %c0_i32 = arith.constant 0 : i32
    return %arg0, %arg1 : i32, i32
  }
}

</mosaic_0001>

<bundles_post_ra>
// kernel: tpu_custom_call.1
= control target key start
LH: loop header
LB: loop body
LE: loop exit
PB: predicated region body
PF: predicated region fallthrough
CT: control target
= control target key end

     0   :  { %8 = vsyncpa [#allocation3], 0  ;;  %s2020_s0 = inlined_call_operand.hbm [shape: bf16[512,128], index: 0, kind: input, shape index: {}]   ;;  %s2021_s1 = inlined_call_operand.hbm [shape: bf16[128,128], index: 1, kind: input, shape index: {}]   ;;  %s2022_s2 = inlined_call_operand.vmem [shape: f32[1,128], index: 2, kind: input, shape index: {}]   ;;  %s2023_s3 = inlined_call_operand.hbm [shape: f32[512,128], index: 3, kind: output, shape index: {}]  }
   0x1   :  { %10 = vsyncpa [#allocation3 + $0x1], 0 }
   0x2   :  { %11 = vsyncpa [#allocation6], 0 }
   0x3   :  { %12 = vsyncpa [#allocation4], 0 }
   0x4   :  { %14 = vsyncpa [#allocation4 + $0x1], 0  ;;  %s1547_s12 = smov 0   ;;  %s1549_s13 = smov 0  }
   0x5   :  { %s1551_s14 = smov 0   ;;  %s1553_s15 = smov 0  }
   0x6   :  { %s1555_s16 = smov 0   ;;  %s1557_s17 = smov 0  }
   0x7 LB: > { %s980_s18 = sadd.s32 4294967295, %s1518_s17   ;;  %s981_s19 = sadd.s32 4294967294, %s1518_s17   ;;  %s1518_s17 = sphi %s1557_s17, %s20_s17   ;;  %s1514_s16 = sphi %s1555_s16, %s2047_s16   ;;  %s1510_s15 = sphi %s1553_s15, %s2046_s15   ;;  %s1506_s14 = sphi %s1551_s14, %s2045_s14   ;;  %s1502_s13 = sphi %s1549_s13, %s2044_s13   ;;  %s1498_s12 = sphi %s1547_s12, %s2043_s12  }
   0x8   : > { %p52_p0 = scmp.ne.s32.totalorder %s1502_s13, %s1498_s12  ;;  %p1581_p1 = scmp.eq.s32.totalorder %s980_s18, 0 }
   0x9   : > { %p1585_p2 = scmp.eq.s32.totalorder %s980_s18, 1  ;;  %p136_p3 = scmp.eq.s32.totalorder %s981_s19, 1 }
   0xa   : > { %s2028_s20 = scalar_select %p1581_p1, 1, 0 }
   0xb   : > { %s2029_s21 = scalar_select %p1585_p2, 1, 0 }
   0xc   : > { %p1591_p4 = por %p1581_p1, %p52_p0  ;;  %p982_p5 = scmp.ge.s32.totalorder %s1518_s17, 1 }
   0xd   : > { %p1596_p6 = por %p136_p3, %p52_p0  ;;  %p143_p7 = scmp.lt.s32.totalorder %s1518_s17, 3 }
   0xe   : > { %s2030_s22 = scalar_select %p1591_p4, 1, 0 }
   0xf   : > { %s2031_s23 = scalar_select %p1596_p6, 1, 0 }
  0x10   : > { %p1601_p8 = pnand %p982_p5, %p143_p7  ;;  %s1520_s25 = smov [#allocation5]  }
  0x11   : > { %s157_s26 = sshll.u32 %s1520_s25, 4  ;;  %s32_s28 = sadd.s32 1, %s1514_s16  ;;  %s158_s26 = int_to_ptr.vmem [resolvable:$true] %s157_s26 }
  0x12   : > { %s2032_s24 = scalar_select %p1601_p8, 1, 0 }
  0x13   : > { %p1153_p9 = pneg %p1601_p8  ;;  %s1374_s4 = scalar_lea.hbm %s2021_s1, 1024 }
  0x14   : > { %p1375_p12 = scmp.ne.s32.totalorder %s2021_s1, %s1374_s4  ;;  %p1381_p5 = scmp.lt.u32.totalorder %s1374_s4, %s2021_s1 }
  0x15   : > { %p1610_p11 = pnand %p1153_p9, %p1581_p1 }
  0x17   : > { %p1376_p13 = pneg %p1610_p11 }
  0x19   : > { %p1377_p0 = pnand %p1376_p13, %p1375_p12 }
  0x1b   : > { %p1378_p3 = pneg %p1377_p0 }
  0x1d   : > { %p1383_p7 = pnand %p1381_p5, %p1378_p3 }
  0x1f   : > { %1386 = shalt.err (!%p1383_p7)
}
  0x20   : > { %s1387_s9 = scalar_lea.vmem %s158_s26, 1024  ;;  %p1395_p1 = scmp.lt.s32.totalorder %s158_s26, %s158_s26 }
  0x21   : > { %p1388_p9 = scmp.ne.s32.totalorder %s158_s26, %s1387_s9  ;;  %p1396_p4 = scmp.lt.s32.totalorder %s1387_s9, %s1387_s9 }
  0x23   : > { %p1390_p10 = pnand %p1388_p9, %p1376_p13  ;;  %p1397_p8 = por %p1396_p4, %p1395_p1 }
  0x25   : > { %p1391_p6 = pneg %p1390_p10 }
  0x27   : > { %p1398_p2 = pnand %p1397_p8, %p1391_p6 }
  0x29   : > { %1401 = shalt.err (!%p1398_p2)
}
  0x2a   : > { %s1521_s10 = smov 64   ;;  %s1522_s11 = smov 4  }
  0x2b   : > { %1156 = dma.hbm_to_vmem [thread:$0]  (!%p1610_p11), %s2021_s1, 1024, %s158_s26, [#allocation6], %s1521_s10, %s1521_s10, %s1522_s11  }
  0x2c   : > { %p34_p1 = scmp.ge.s32.totalorder %s32_s28, 2  ;;  %s39_s25 = sadd.s32 1, %s1506_s14 }
  0x2d   : > { %p46_p2 = scmp.ne.s32.totalorder %s1506_s14, %s1502_s13  ;;  %p47_p4 = scmp.eq.s32.totalorder %s1518_s17, 0 }
  0x2e   : > { %s2049_s28 = smov (%p34_p1, %s32_s28), 0  ;;  %p2035_p8 = scmp.ne.s32.totalorder %s2029_s21, 0 }
  0x2f   : > { %p1640_p6 = por %p47_p4, %p46_p2  ;;  %s36_s30 = ssub.s32 %s1514_s16, %s2049_s28 }
  0x30   : > { %p1646_p10 = por %p2035_p8, %p46_p2  ;;  %p1166_p12 = scmp.lt.s32.totalorder %s1518_s17, 2 }
  0x31   : > { %p37_p11 = scmp.eq.s32.totalorder %s36_s30, 0  ;;  %s177_s26 = sand.u32 1, %s1506_s14  }
  0x32   : > { %s986_s4 = sshll.u32 %s177_s26, 7  ;;  %s1055_s6 = sshll.u32 %s1514_s16, 11 }
  0x33   : > { %s1655_s5 = scalar_select %p37_p11, %s1506_s14, %s39_s25  }
  0x34   : > { %s1661_s9 = scalar_lea.hbm %s2020_s0, %s1055_s6  ;;  %s181_s21 = scalar_lea.vmem [#allocation2], %s986_s4 }
  0x35   : > { %s188_s18 = sshll.u32 %s181_s21, 4  ;;  %p1667_p13 = pnand %p1166_p12, %p1640_p6  ;;  %s1663_s18 = int_to_ptr.vmem [resolvable:$true] %s188_s18 }
  0x36   : > { %s1671_s25 = scalar_lea.sflag [#allocation3], %s177_s26  ;;  %s1402_s30 = scalar_lea.hbm %s1661_s9, 2048 }
  0x37   : > { %p1403_p0 = scmp.ne.s32.totalorder %s1661_s9, %s1402_s30  ;;  %p1404_p3 = pneg %p1667_p13 }
  0x38   : > { %s1407_s29 = scalar_lea.hbm %s2020_s0, 4096  ;;  %p1408_p9 = scmp.lt.u32.totalorder %s1661_s9, %s2020_s0 }
  0x39   : > { %p1405_p5 = pnand %p1404_p3, %p1403_p0  ;;  %p1409_p1 = scmp.lt.u32.totalorder %s1407_s29, %s1402_s30 }
  0x3a   : > { %p1411_p4 = scmp.lt.u32.totalorder %s1402_s30, %s1661_s9 }
  0x3b   : > { %p1406_p7 = pneg %p1405_p5  ;;  %p1410_p2 = por %p1409_p1, %p1408_p9 }
  0x3d   : > { %p1412_p6 = por %p1411_p4, %p1410_p2 }
  0x3f   : > { %p1413_p8 = pnand %p1412_p6, %p1406_p7 }
  0x41   : > { %1416 = shalt.err (!%p1413_p8)
}
  0x42   : > { %s1417_s26 = scalar_lea.vmem %s1663_s18, 2048  ;;  %s1523_s21 = smov [#allocation2]  }
  0x43   : > { %p1418_p12 = scmp.ne.s32.totalorder %s1663_s18, %s1417_s26  ;;  %s1422_s4 = sshll.u32 %s1523_s21, 4  ;;  %s1423_s4 = int_to_ptr.vmem [resolvable:$false] %s1422_s4 }
  0x44   : > { %s1424_s6 = scalar_lea.vmem %s1423_s4, 4096  ;;  %p1425_p5 = scmp.lt.s32.totalorder %s1663_s18, %s1423_s4 }
  0x45   : > { %p1420_p11 = pnand %p1418_p12, %p1404_p3  ;;  %p1426_p9 = scmp.lt.s32.totalorder %s1424_s6, %s1417_s26 }
  0x47   : > { %p1421_p0 = pneg %p1420_p11  ;;  %p1427_p1 = por %p1426_p9, %p1425_p5 }
  0x49   : > { %p1428_p2 = pnand %p1427_p1, %p1421_p0 }
  0x4b   : > { %1431 = shalt.err (!%p1428_p2)
}
  0x4c   : > { %1160 = dma.hbm_to_vmem [thread:$0]  (!%p1667_p13), %s1661_s9, 2048, %s1663_s18, %s1671_s25, %s1521_s10, %s1521_s10, %s1522_s11  }
  0x4d   : > { %p2038_p3 = scmp.ne.s32.totalorder %s2032_s24, 0 }
  0x4e   : > { %s1705_s30 = sand.u32 (!%p2038_p3), 1, %s1502_s13   ;;  %p2039_p7 = scmp.ne.s32.totalorder (!%p2038_p3), %s2030_s22, 0 }
  0x4f   : > { %200 = sbr.rel (%p2038_p3) target bundleno = 439 (0x1b7), region = 32  ;;  %s990_s29 = sshll.u32 (!%p2038_p3), %s1705_s30, 7 }
  0x50   : > { %s203_s7 = scalar_lea.sflag (!%p2038_p3), [#allocation3], %s1705_s30  ;;  %s1709_s8 = scalar_lea.vmem (!%p2038_p3), [#allocation2], %s990_s29 }
  0x56   : > { %1485 = dma.done.wait (%p2039_p7), %s203_s7, 2048  }
  0x57   : > { %1487 = vsyncadd (%p2039_p7), %s203_s7, 4294965248  ;;  %p2040_p13 = scmp.ne.s32.totalorder %s2028_s20, 0 }
  0x59   : > { %1489 = dma.done.wait (%p2040_p13), [#allocation6], 1024  }
  0x5a   : > { %1491 = vsyncadd (%p2040_p13), [#allocation6], 4294966272  ;;  %v1222_v0 = vld [vmem:[#allocation5] sm:$0xff]   ;;  %v1223_v1 = vld [vmem:[#allocation5 + $0x8] sm:$0xff]   ;;  %s992_s24 = sshll.u32 %s1705_s30, 8  ;;  %s1056_s11 = sshll.u32 %s1510_s15, 12 }
  0x5b   : > { %1081 = vmatprep.subr.bf16.mxu0 %v1222_v0  ;;  %1129 = vmatprep.subr.bf16.mxu1 %v1222_v0  ;;  %v1224_v2 = vld [vmem:[#allocation5 + $0x10] sm:$0xff]   ;;  %v1225_v3 = vld [vmem:[#allocation5 + $0x18] sm:$0xff]   ;;  %v1230_v4 = vld [vmem:[%s1709_s8] sm:$0xff]   ;;  %s1843_s10 = scalar_lea.vmem [#allocation7], %s992_s24  ;;  %s1965_s15 = scalar_lea.hbm %s2023_s3, %s1056_s11 }
  0x5c   : > { %1082 = vmatpush3.bf16.msra.mxu0 %v1222_v0  ;;  %1137 = vmatpush3.bf16.msra.mxu1 %v1222_v0  ;;  %v1231_v5 = vld [vmem:[%s1709_s8 + $0x40] sm:$0xff]   ;;  %v1227_v7 = vld [vmem:[#allocation5 + $0x28] sm:$0xff]   ;;  %v1228_v8 = vld [vmem:[#allocation5 + $0x30] sm:$0xff]   ;;  %s873_s9 = sshll.u32 %s1843_s10, 4  ;;  %s859_s25 = scalar_lea.sflag [#allocation4], %s1705_s30  ;;  %s1967_s9 = int_to_ptr.vmem [resolvable:$true] %s873_s9 }
  0x5d   : > { %1083 = vmatprep.subr.bf16.mxu0 %v1223_v1  ;;  %1130 = vmatprep.subr.bf16.mxu1 %v1223_v1  ;;  %v1226_v6 = vld [vmem:[#allocation5 + $0x20] sm:$0xff]   ;;  %v1229_v9 = vld [vmem:[#allocation5 + $0x38] sm:$0xff]   ;;  %v1232_v10 = vld [vmem:[%s1709_s8 + $0x8] sm:$0xff]   ;;  %s1432_s26 = scalar_lea.vmem %s1967_s9, 4096  ;;  %s1524_s21 = smov [#allocation7]  }
  0x5e   : > { %1097 = vmatprep.mubr.bf16.mxu0 %v1230_v4  ;;  %1113 = vmatprep.mubr.bf16.mxu1 %v1231_v5  ;;  %v1233_v11 = vld [vmem:[%s1709_s8 + $0x48] sm:$0xff]   ;;  %v1234_v12 = vld [vmem:[%s1709_s8 + $0x10] sm:$0xff]   ;;  %v1236_v14 = vld [vmem:[%s1709_s8 + $0x18] sm:$0xff]   ;;  %p1433_p4 = scmp.ne.s32.totalorder %s1967_s9, %s1432_s26  ;;  %s1436_s4 = sshll.u32 %s1524_s21, 4  ;;  %s1437_s4 = int_to_ptr.vmem [resolvable:$false] %s1436_s4 }
  0x5f   : > { %v1235_v13 = vld [vmem:[%s1709_s8 + $0x50] sm:$0xff]   ;;  %v1237_v15 = vld [vmem:[%s1709_s8 + $0x58] sm:$0xff]   ;;  %v1238_v16 = vld [vmem:[%s1709_s8 + $0x20] sm:$0xff]   ;;  %s1438_s6 = scalar_lea.vmem %s1437_s4, 8192  ;;  %p1439_p12 = scmp.lt.s32.totalorder %s1967_s9, %s1437_s4 }
  0x60   : > { %1084 = vmatpush3.bf16.msra.mxu0 %v1223_v1  ;;  %1138 = vmatpush3.bf16.msra.mxu1 %v1223_v1  ;;  %v1239_v17 = vld [vmem:[%s1709_s8 + $0x60] sm:$0xff]   ;;  %v1240_v18 = vld [vmem:[%s1709_s8 + $0x28] sm:$0xff]   ;;  %v1242_v20 = vld [vmem:[%s1709_s8 + $0x30] sm:$0xff]   ;;  %p1434_p6 = pnand %p1433_p4, %p1646_p10  ;;  %p1440_p11 = scmp.lt.s32.totalorder %s1438_s6, %s1432_s26 }
  0x61   : > { %1085 = vmatprep.subr.bf16.mxu0 %v1224_v2  ;;  %1131 = vmatprep.subr.bf16.mxu1 %v1224_v2  ;;  %v1241_v19 = vld [vmem:[%s1709_s8 + $0x68] sm:$0xff]   ;;  %v1243_v21 = vld [vmem:[%s1709_s8 + $0x70] sm:$0xff]   ;;  %v1244_v22 = vld [vmem:[%s1709_s8 + $0x38] sm:$0xff]  }
  0x62   : > { %v1245_v23 = vld [vmem:[%s1709_s8 + $0x78] sm:$0xff]   ;;  %v1738_v24 = vld [vmem:[%s2022_s2] ss:$0 sm:$0xff]  ;;  %p1435_p8 = pneg %p1434_p6  ;;  %p1441_p0 = por %p1440_p11, %p1439_p12 }
  0x64   : > { %1086 = vmatpush3.bf16.msra.mxu0 %v1224_v2  ;;  %1139 = vmatpush3.bf16.msra.mxu1 %v1224_v2  ;;  %p1442_p5 = pnand %p1441_p0, %p1435_p8 }
  0x65   : > { %1087 = vmatprep.subr.bf16.mxu0 %v1225_v3  ;;  %1132 = vmatprep.subr.bf16.mxu1 %v1225_v3 }
  0x68   : > { %1088 = vmatpush3.bf16.msra.mxu0 %v1225_v3  ;;  %1140 = vmatpush3.bf16.msra.mxu1 %v1225_v3 }
  0x69   : > { %1089 = vmatprep.subr.bf16.mxu0 %v1226_v6  ;;  %1133 = vmatprep.subr.bf16.mxu1 %v1226_v6 }
  0x6c   : > { %1090 = vmatpush3.bf16.msra.mxu0 %v1226_v6  ;;  %1141 = vmatpush3.bf16.msra.mxu1 %v1226_v6 }
  0x6d   : > { %1091 = vmatprep.subr.bf16.mxu0 %v1227_v7  ;;  %1134 = vmatprep.subr.bf16.mxu1 %v1227_v7 }
  0x70   : > { %1092 = vmatpush3.bf16.msra.mxu0 %v1227_v7  ;;  %1142 = vmatpush3.bf16.msra.mxu1 %v1227_v7 }
  0x71   : > { %1093 = vmatprep.subr.bf16.mxu0 %v1228_v8  ;;  %1135 = vmatprep.subr.bf16.mxu1 %v1228_v8 }
  0x74   : > { %1094 = vmatpush3.bf16.msra.mxu0 %v1228_v8  ;;  %1143 = vmatpush3.bf16.msra.mxu1 %v1228_v8 }
  0x75   : > { %1095 = vmatprep.subr.bf16.mxu0 %v1229_v9  ;;  %1136 = vmatprep.subr.bf16.mxu1 %v1229_v9 }
  0x78   : > { %1096 = vmatpush3.bf16.msra.mxu0 %v1229_v9  ;;  %1144 = vmatpush3.bf16.msra.mxu1 %v1229_v9 }
  0x7b   : > { %1098 = vmatmul.mubr.bf16.vlgmr.msra.gmra.mrb[0].mxu0 %v1232_v10  ;;  %1114 = vmatmul.mubr.bf16.vlgmr.msra.gmra.mrb[0].mxu1 %v1233_v11 }
  0x7c   : > { %1101 = vmatprep.mubr.bf16.mxu0 %v1234_v12  ;;  %1117 = vmatprep.mubr.bf16.mxu1 %v1235_v13 }
  0x83   : > { %1102 = vmatmul.mubr.bf16.gmra.mrb[4].mxu0 %v1236_v14  ;;  %1118 = vmatmul.mubr.bf16.gmra.mrb[4].mxu1 %v1237_v15 }
  0x84   : > { %1105 = vmatprep.mubr.bf16.mxu0 %v1238_v16  ;;  %1121 = vmatprep.mubr.bf16.mxu1 %v1239_v17 }
  0x8b   : > { %1106 = vmatmul.mubr.bf16.gmra.mrb[8].mxu0 %v1240_v18  ;;  %1122 = vmatmul.mubr.bf16.gmra.mrb[8].mxu1 %v1241_v19 }
  0x8c   : > { %1109 = vmatprep.mubr.bf16.mxu0 %v1242_v20  ;;  %1125 = vmatprep.mubr.bf16.mxu1 %v1243_v21 }
  0x93   : > { %1110 = vmatmul.mubr.bf16.gmra.mrb[12].mxu0 %v1244_v22  ;;  %1126 = vmatmul.mubr.bf16.gmra.mrb[12].mxu1 %v1245_v23 }
 0x14e   : > { %v1099_v25 = vpop.f32.mrb[0].mxu0  ;;  %v1115_v26 = vpop.f32.mrb[0].mxu1 }
 0x14f   : > { %v1741_v27 = vadd.f32 %v1099_v25, %v1738_v24  ;;  %v1744_v28 = vadd.f32 %v1115_v26, %v1738_v24  ;;  %v475_v29 = vpop.f32.mrb[1].mxu0  ;;  %v539_v30 = vpop.f32.mrb[1].mxu1 }
 0x150   : > { %v1747_v31 = vadd.f32 %v1738_v24, %v475_v29  ;;  %v1750_v32 = vadd.f32 %v1738_v24, %v539_v30  ;;  %v1100_v33 = vpop.f32.mrb[2].mxu0  ;;  %v1116_v34 = vpop.f32.mrb[2].mxu1 }
 0x151   : > { %v1020_v35 = vmul.f32 -1.442695, %v1741_v27  ;;  %v1036_v36 = vmul.f32 -1.442695, %v1744_v28  ;;  %v1755_v37 = vadd.f32 %v1100_v33, %v1738_v24  ;;  %v1758_v38 = vadd.f32 %v1116_v34, %v1738_v24  ;;  %v478_v39 = vpop.f32.mrb[3].mxu0  ;;  %v542_v40 = vpop.f32.mrb[3].mxu1 }
 0x152   : > { %v1018_v41 = vmul.f32 -1.442695, %v1747_v31  ;;  %v1034_v42 = vmul.f32 -1.442695, %v1750_v32  ;;  %v1763_v43 = vadd.f32 %v1738_v24, %v478_v39  ;;  %v1766_v44 = vadd.f32 %v1738_v24, %v542_v40 }
 0x153   : > { %1246 = vpow2.f32 %v1020_v35  ;;  %v1021_v45 = vmul.f32 -1.442695, %v1755_v37  ;;  %v1037_v46 = vmul.f32 -1.442695, %v1758_v38 }
 0x154   : > { %1248 = vpow2.f32 %v1036_v36  ;;  %v1019_v47 = vmul.f32 -1.442695, %v1763_v43  ;;  %v1035_v48 = vmul.f32 -1.442695, %v1766_v44 }
 0x155   : > { %1250 = vpow2.f32 %v1018_v41 }
 0x156   : > { %1252 = vpow2.f32 %v1034_v42  ;;  %v1103_v49 = vpop.f32.mrb[4].mxu0  ;;  %v1119_v50 = vpop.f32.mrb[4].mxu1 }
 0x157   : > { %1254 = vpow2.f32 %v1021_v45  ;;  %v1773_v51 = vadd.f32 %v1103_v49, %v1738_v24  ;;  %v1776_v52 = vadd.f32 %v1119_v50, %v1738_v24  ;;  %v491_v53 = vpop.f32.mrb[5].mxu0  ;;  %v555_v54 = vpop.f32.mrb[5].mxu1 }
 0x158   : > { %1256 = vpow2.f32 %v1037_v46  ;;  %v1779_v55 = vadd.f32 %v1738_v24, %v491_v53  ;;  %v1782_v56 = vadd.f32 %v1738_v24, %v555_v54  ;;  %v1104_v57 = vpop.f32.mrb[6].mxu0  ;;  %v1120_v58 = vpop.f32.mrb[6].mxu1 }
 0x159   : > { %1258 = vpow2.f32 %v1019_v47  ;;  %v1024_v59 = vmul.f32 -1.442695, %v1773_v51  ;;  %v1040_v60 = vmul.f32 -1.442695, %v1776_v52  ;;  %v1787_v61 = vadd.f32 %v1104_v57, %v1738_v24  ;;  %v494_v62 = vpop.f32.mrb[7].mxu0  ;;  %v558_v63 = vpop.f32.mrb[7].mxu1 }
 0x15a   : > { %1260 = vpow2.f32 %v1035_v48  ;;  %v1022_v0 = vmul.f32 -1.442695, %v1779_v55  ;;  %v1038_v1 = vmul.f32 -1.442695, %v1782_v56  ;;  %v1799_v33 = vadd.f32 %v1120_v58, %v1738_v24 }
 0x15b   : > { %1262 = vpow2.f32 %v1024_v59  ;;  %v1025_v2 = vmul.f32 -1.442695, %v1787_v61  ;;  %v1802_v36 = vadd.f32 %v1738_v24, %v494_v62  ;;  %v1806_v42 = vadd.f32 %v1738_v24, %v558_v63 }
 0x15c   : > { %1264 = vpow2.f32 %v1040_v60  ;;  %v1041_v58 = vmul.f32 -1.442695, %v1799_v33 }
 0x15d   : > { %v1247_v3 = vpop.eup %1246  ;;  %1266 = vpow2.f32 %v1022_v0 }
 0x15e   : > { %v1249_v4 = vpop.eup %1248  ;;  %v700_v5 = vadd.f32 1.0, %v1247_v3  ;;  %1268 = vpow2.f32 %v1038_v1  ;;  %v1107_v6 = vpop.f32.mrb[8].mxu0  ;;  %v1023_v1 = vmul.f32 -1.442695, %v1802_v36 }
 0x15f   : > { %v1123_v7 = vpop.f32.mrb[8].mxu1  ;;  %v1251_v8 = vpop.eup %1250  ;;  %v716_v9 = vadd.f32 1.0, %v1249_v4  ;;  %1270 = vpow2.f32 %v1025_v2  ;;  %v1811_v49 = vadd.f32 %v1107_v6, %v1738_v24  ;;  %v1039_v6 = vmul.f32 -1.442695, %v1806_v42 }
 0x160   : > { %v507_v10 = vpop.f32.mrb[9].mxu0  ;;  %v571_v11 = vpop.f32.mrb[9].mxu1  ;;  %1272 = vrcp.f32 %v700_v5  ;;  %v698_v13 = vadd.f32 1.0, %v1251_v8  ;;  %v1819_v59 = vadd.f32 %v1123_v7, %v1738_v24 }
 0x161   : > { %v1253_v12 = vpop.eup %1252  ;;  %v1108_v14 = vpop.f32.mrb[10].mxu0  ;;  %1274 = vrcp.f32 %v716_v9  ;;  %v1827_v2 = vadd.f32 %v1738_v24, %v507_v10  ;;  %v1834_v7 = vadd.f32 %v1738_v24, %v571_v11 }
 0x162   : > { %v1792_v15 = vpop.f32.mrb[10].mxu1  ;;  %v1255_v16 = vpop.eup %1254  ;;  %v714_v17 = vadd.f32 1.0, %v1253_v12  ;;  %1276 = vrcp.f32 %v698_v13  ;;  %v1028_v12 = vmul.f32 -1.442695, %v1811_v49  ;;  %v1839_v10 = vadd.f32 %v1108_v14, %v1738_v24 }
 0x163   : > { %v1794_v18 = vpop.f32.mrb[11].mxu0  ;;  %v1257_v19 = vpop.eup %1256  ;;  %v701_v20 = vadd.f32 1.0, %v1255_v16  ;;  %v1850_v11 = vadd.f32 %v1792_v15, %v1738_v24  ;;  %v1042_v15 = vmul.f32 -1.442695, %v1834_v7 }
 0x164   : > { %v1796_v21 = vpop.f32.mrb[11].mxu1  ;;  %v1259_v22 = vpop.eup %1258  ;;  %1278 = vrcp.f32 %v714_v17  ;;  %v717_v23 = vadd.f32 1.0, %v1257_v19  ;;  %v1026_v17 = vmul.f32 -1.442695, %v1827_v2  ;;  %v1857_v19 = vadd.f32 %v1738_v24, %v1794_v18 }
 0x165   : > { %v1261_v25 = vpop.eup %1260  ;;  %1280 = vrcp.f32 %v701_v20  ;;  %v699_v26 = vadd.f32 1.0, %v1259_v22  ;;  %v1864_v22 = vadd.f32 %v1738_v24, %v1796_v21  ;;  %v1029_v18 = vmul.f32 -1.442695, %v1839_v10 }
 0x166   : > { %v1263_v29 = vpop.eup %1262  ;;  %1282 = vrcp.f32 %v717_v23  ;;  %v715_v30 = vadd.f32 1.0, %v1261_v25  ;;  %v1111_v39 = vpop.f32.mrb[12].mxu0  ;;  %v1045_v21 = vmul.f32 -1.442695, %v1850_v11 }
 0x167   : > { %v1265_v34 = vpop.eup %1264  ;;  %1284 = vrcp.f32 %v699_v26  ;;  %v704_v35 = vadd.f32 1.0, %v1263_v29  ;;  %v1127_v45 = vpop.f32.mrb[12].mxu1  ;;  %v1870_v25 = vadd.f32 %v1111_v39, %v1738_v24 }
 0x168   : > { %v1267_v40 = vpop.eup %1266  ;;  %1286 = vrcp.f32 %v715_v30  ;;  %v720_v41 = vadd.f32 1.0, %v1265_v34  ;;  %v1808_v46 = vpop.f32.mrb[13].mxu0  ;;  %v1876_v29 = vadd.f32 %v1127_v45, %v1738_v24  ;;  %v1027_v34 = vmul.f32 -1.442695, %v1857_v19 }
 0x169   : > { %v1269_v47 = vpop.eup %1268  ;;  %1288 = vrcp.f32 %v704_v35  ;;  %v702_v48 = vadd.f32 1.0, %v1267_v40  ;;  %v1813_v50 = vpop.f32.mrb[13].mxu1 }
 0x16a   : > { %v1815_v53 = vpop.f32.mrb[14].mxu0  ;;  %v1271_v54 = vpop.eup %1270  ;;  %1290 = vrcp.f32 %v720_v41  ;;  %v718_v57 = vadd.f32 1.0, %v1269_v47 }
 0x16b   : > { %v1821_v60 = vpop.f32.mrb[14].mxu1  ;;  %v1823_v62 = vpop.f32.mrb[15].mxu0  ;;  %1292 = vrcp.f32 %v702_v48  ;;  %v705_v0 = vadd.f32 1.0, %v1271_v54 }
 0x16c   : > { %v1273_v63 = vpop.eup %1272  ;;  %v1829_v3 = vpop.f32.mrb[15].mxu1  ;;  %1294 = vrcp.f32 %v718_v57 }
 0x16d   : > { %v1275_v4 = vpop.eup %1274  ;;  %v796_v5 = vmul.f32 %v1273_v63, %v1741_v27  ;;  %1296 = vrcp.f32 %v705_v0 }
 0x16e   : > { %v1277_v8 = vpop.eup %1276  ;;  %v812_v9 = vmul.f32 %v1275_v4, %v1744_v28  ;;  %1298 = vpow2.f32 %v1041_v58  ;;  %v1044_v28 = vmul.f32 -1.442695, %v1819_v59 }
 0x16f   : > { %v1279_v13 = vpop.eup %1278  ;;  %828 = vst [vmem:[%s1843_s10 + $0x10] sm:$0xff] %v796_v5  ;;  %v794_v27 = vmul.f32 %v1277_v8, %v1747_v31  ;;  %1300 = vpow2.f32 %v1023_v1 }
 0x170   : > { %v1281_v14 = vpop.eup %1280  ;;  %844 = vst [vmem:[%s1843_s10 + $0x90] sm:$0xff] %v812_v9  ;;  %v810_v16 = vmul.f32 %v1279_v13, %v1750_v32  ;;  %1302 = vpow2.f32 %v1039_v6 }
 0x171   : > { %v1283_v31 = vpop.eup %1282  ;;  %826 = vst [vmem:[%s1843_s10] sm:$0xff] %v794_v27  ;;  %v797_v20 = vmul.f32 %v1281_v14, %v1755_v37  ;;  %1304 = vpow2.f32 %v1028_v12  ;;  %v1898_v14 = vadd.f32 %v1738_v24, %v1808_v46  ;;  %v1910_v46 = vadd.f32 %v1821_v60, %v1738_v24 }
 0x172   : > { %v1285_v32 = vpop.eup %1284  ;;  %842 = vst [vmem:[%s1843_s10 + $0x80] sm:$0xff] %v810_v16  ;;  %v813_v23 = vmul.f32 %v1283_v31, %v1758_v38  ;;  %1306 = vpow2.f32 %v1044_v28  ;;  %v1902_v31 = vadd.f32 %v1738_v24, %v1813_v50  ;;  %v1920_v60 = vadd.f32 %v1738_v24, %v1829_v3 }
 0x173   : > { %v1287_v37 = vpop.eup %1286  ;;  %829 = vst [vmem:[%s1843_s10 + $0x18] sm:$0xff] %v797_v20  ;;  %v795_v26 = vmul.f32 %v1285_v32, %v1763_v43  ;;  %1308 = vpow2.f32 %v1026_v17  ;;  %v1043_v43 = vmul.f32 -1.442695, %v1864_v22  ;;  %v1906_v32 = vadd.f32 %v1815_v53, %v1738_v24 }
 0x174   : > { %v1289_v30 = vpop.eup %1288  ;;  %845 = vst [vmem:[%s1843_s10 + $0x98] sm:$0xff] %v813_v23  ;;  %v811_v38 = vmul.f32 %v1287_v37, %v1766_v44  ;;  %1310 = vpow2.f32 %v1042_v15  ;;  %v1032_v44 = vmul.f32 -1.442695, %v1870_v25  ;;  %v1030_v50 = vmul.f32 -1.442695, %v1898_v14 }
 0x175   : > { %v1291_v35 = vpop.eup %1290  ;;  %827 = vst [vmem:[%s1843_s10 + $0x8] sm:$0xff] %v795_v26  ;;  %v800_v39 = vmul.f32 %v1289_v30, %v1773_v51  ;;  %1312 = vpow2.f32 %v1029_v18  ;;  %v1048_v51 = vmul.f32 -1.442695, %v1876_v29 }
 0x176   : > { %v1293_v40 = vpop.eup %1292  ;;  %843 = vst [vmem:[%s1843_s10 + $0x88] sm:$0xff] %v811_v38  ;;  %v816_v41 = vmul.f32 %v1291_v35, %v1776_v52  ;;  %1314 = vpow2.f32 %v1045_v21  ;;  %v1915_v21 = vadd.f32 %v1738_v24, %v1823_v62  ;;  %v1046_v38 = vmul.f32 -1.442695, %v1902_v31 }
 0x177   : > { %v1295_v45 = vpop.eup %1294  ;;  %832 = vst [vmem:[%s1843_s10 + $0x30] sm:$0xff] %v800_v39  ;;  %v798_v47 = vmul.f32 %v1293_v40, %v1779_v55  ;;  %1316 = vpow2.f32 %v1027_v34  ;;  %v1033_v39 = vmul.f32 -1.442695, %v1906_v32  ;;  %v1049_v40 = vmul.f32 -1.442695, %v1910_v46 }
 0x178   : > { %v1297_v48 = vpop.eup %1296  ;;  %848 = vst [vmem:[%s1843_s10 + $0xb0] sm:$0xff] %v816_v41  ;;  %v814_v54 = vmul.f32 %v1295_v45, %v1782_v56  ;;  %1318 = vpow2.f32 %v1043_v43  ;;  %v1031_v24 = vmul.f32 -1.442695, %v1915_v21 }
 0x179   : > { %v1299_v57 = vpop.eup %1298  ;;  %830 = vst [vmem:[%s1843_s10 + $0x20] sm:$0xff] %v798_v47  ;;  %v801_v52 = vmul.f32 %v1297_v48, %v1787_v61  ;;  %1320 = vpow2.f32 %v1032_v44 }
 0x17a   : > { %v1301_v58 = vpop.eup %1300  ;;  %846 = vst [vmem:[%s1843_s10 + $0xa0] sm:$0xff] %v814_v54  ;;  %v721_v63 = vadd.f32 1.0, %v1299_v57  ;;  %1322 = vpow2.f32 %v1048_v51 }
 0x17b   : > { %v1303_v0 = vpop.eup %1302  ;;  %833 = vst [vmem:[%s1843_s10 + $0x38] sm:$0xff] %v801_v52  ;;  %v703_v55 = vadd.f32 1.0, %v1301_v58 }
 0x17c   : > { %v1305_v1 = vpop.eup %1304  ;;  %1324 = vrcp.f32 %v721_v63  ;;  %v719_v4 = vadd.f32 1.0, %v1303_v0 }
 0x17d   : > { %v1307_v5 = vpop.eup %1306  ;;  %1326 = vrcp.f32 %v703_v55  ;;  %v708_v56 = vadd.f32 1.0, %v1305_v1 }
 0x17e   : > { %v1309_v6 = vpop.eup %1308  ;;  %1328 = vrcp.f32 %v719_v4  ;;  %v724_v8 = vadd.f32 1.0, %v1307_v5 }
 0x17f   : > { %v1311_v9 = vpop.eup %1310  ;;  %1330 = vrcp.f32 %v708_v56  ;;  %v706_v61 = vadd.f32 1.0, %v1309_v6 }
 0x180   : > { %v1313_v12 = vpop.eup %1312  ;;  %1332 = vrcp.f32 %v724_v8  ;;  %v722_v13 = vadd.f32 1.0, %v1311_v9 }
 0x181   : > { %v1315_v27 = vpop.eup %1314  ;;  %1334 = vrcp.f32 %v706_v61  ;;  %v709_v28 = vadd.f32 1.0, %v1313_v12 }
 0x182   : > { %v1317_v16 = vpop.eup %1316  ;;  %1336 = vrcp.f32 %v722_v13  ;;  %v725_v17 = vadd.f32 1.0, %v1315_v27 }
 0x183   : > { %v1319_v20 = vpop.eup %1318  ;;  %1338 = vrcp.f32 %v709_v28  ;;  %v707_v15 = vadd.f32 1.0, %v1317_v16 }
 0x184   : > { %v1321_v23 = vpop.eup %1320  ;;  %1340 = vrcp.f32 %v725_v17  ;;  %v723_v18 = vadd.f32 1.0, %v1319_v20 }
 0x185   : > { %v1323_v37 = vpop.eup %1322  ;;  %1342 = vrcp.f32 %v707_v15  ;;  %v712_v26 = vadd.f32 1.0, %v1321_v23 }
 0x186   : > { %v1325_v30 = vpop.eup %1324  ;;  %1344 = vrcp.f32 %v723_v18  ;;  %v728_v53 = vadd.f32 1.0, %v1323_v37 }
 0x187   : > { %v1327_v34 = vpop.eup %1326  ;;  %v817_v35 = vmul.f32 %v1325_v30, %v1799_v33  ;;  %1346 = vrcp.f32 %v712_v26 }
 0x188   : > { %v1329_v43 = vpop.eup %1328  ;;  %v799_v62 = vmul.f32 %v1327_v34, %v1802_v36  ;;  %1348 = vrcp.f32 %v728_v53  ;;  %v1047_v36 = vmul.f32 -1.442695, %v1920_v60 }
 0x189   : > { %v1331_v41 = vpop.eup %1330  ;;  %849 = vst [vmem:[%s1843_s10 + $0xb8] sm:$0xff] %v817_v35  ;;  %v815_v44 = vmul.f32 %v1329_v43, %v1806_v42  ;;  %1350 = vpow2.f32 %v1030_v50 }
 0x18a   : > { %v1333_v33 = vpop.eup %1332  ;;  %831 = vst [vmem:[%s1843_s10 + $0x28] sm:$0xff] %v799_v62  ;;  %v804_v3 = vmul.f32 %v1331_v41, %v1811_v49  ;;  %1352 = vpow2.f32 %v1046_v38 }
 0x18b   : > { %v1335_v45 = vpop.eup %1334  ;;  %847 = vst [vmem:[%s1843_s10 + $0xa8] sm:$0xff] %v815_v44  ;;  %v820_v47 = vmul.f32 %v1333_v33, %v1819_v59  ;;  %1354 = vpow2.f32 %v1033_v39 }
 0x18c   : > { %v1337_v51 = vpop.eup %1336  ;;  %836 = vst [vmem:[%s1843_s10 + $0x50] sm:$0xff] %v804_v3  ;;  %v802_v42 = vmul.f32 %v1335_v45, %v1827_v2  ;;  %1356 = vpow2.f32 %v1049_v40 }
 0x18d   : > { %v1339_v48 = vpop.eup %1338  ;;  %852 = vst [vmem:[%s1843_s10 + $0xd0] sm:$0xff] %v820_v47  ;;  %v818_v49 = vmul.f32 %v1337_v51, %v1834_v7  ;;  %1358 = vpow2.f32 %v1031_v24 }
 0x18e   : > { %v1341_v54 = vpop.eup %1340  ;;  %834 = vst [vmem:[%s1843_s10 + $0x40] sm:$0xff] %v802_v42  ;;  %v805_v57 = vmul.f32 %v1339_v48, %v1839_v10  ;;  %1360 = vpow2.f32 %v1047_v36 }
 0x18f   : > { %v1343_v59 = vpop.eup %1342  ;;  %850 = vst [vmem:[%s1843_s10 + $0xc0] sm:$0xff] %v818_v49  ;;  %v821_v52 = vmul.f32 %v1341_v54, %v1850_v11 }
 0x190   : > { %v1345_v2 = vpop.eup %1344  ;;  %837 = vst [vmem:[%s1843_s10 + $0x58] sm:$0xff] %v805_v57  ;;  %v803_v58 = vmul.f32 %v1343_v59, %v1857_v19 }
 0x191   : > { %v1347_v63 = vpop.eup %1346  ;;  %853 = vst [vmem:[%s1843_s10 + $0xd8] sm:$0xff] %v821_v52  ;;  %v819_v7 = vmul.f32 %v1345_v2, %v1864_v22 }
 0x192   : > { %v1349_v0 = vpop.eup %1348  ;;  %835 = vst [vmem:[%s1843_s10 + $0x48] sm:$0xff] %v803_v58  ;;  %v808_v55 = vmul.f32 %v1347_v63, %v1870_v25 }
 0x193   : > { %v1351_v10 = vpop.eup %1350  ;;  %851 = vst [vmem:[%s1843_s10 + $0xc8] sm:$0xff] %v819_v7  ;;  %v824_v1 = vmul.f32 %v1349_v0, %v1876_v29 }
 0x194   : > { %v1353_v4 = vpop.eup %1352  ;;  %840 = vst [vmem:[%s1843_s10 + $0x70] sm:$0xff] %v808_v55  ;;  %v710_v11 = vadd.f32 1.0, %v1351_v10 }
 0x195   : > { %v1355_v5 = vpop.eup %1354  ;;  %856 = vst [vmem:[%s1843_s10 + $0xf0] sm:$0xff] %v824_v1  ;;  %v726_v56 = vadd.f32 1.0, %v1353_v4 }
 0x196   : > { %v1357_v6 = vpop.eup %1356  ;;  %1362 = vrcp.f32 %v710_v11  ;;  %v713_v19 = vadd.f32 1.0, %v1355_v5 }
 0x197   : > { %v1359_v8 = vpop.eup %1358  ;;  %1364 = vrcp.f32 %v726_v56  ;;  %v729_v22 = vadd.f32 1.0, %v1357_v6 }
 0x198   : > { %v1361_v25 = vpop.eup %1360  ;;  %1366 = vrcp.f32 %v713_v19  ;;  %v711_v9 = vadd.f32 1.0, %v1359_v8 }
 0x199   : > { %1368 = vrcp.f32 %v729_v22  ;;  %v727_v29 = vadd.f32 1.0, %v1361_v25 }
 0x19a   : > { %1370 = vrcp.f32 %v711_v9 }
 0x19b   : > { %1372 = vrcp.f32 %v727_v29 }
 0x1a0   : > { %v1363_v61 = vpop.eup %1362 }
 0x1a1   : > { %v1365_v12 = vpop.eup %1364  ;;  %v806_v13 = vmul.f32 %v1363_v61, %v1898_v14 }
 0x1a2   : > { %v1367_v27 = vpop.eup %1366  ;;  %v822_v28 = vmul.f32 %v1365_v12, %v1902_v31 }
 0x1a3   : > { %v1369_v16 = vpop.eup %1368  ;;  %838 = vst [vmem:[%s1843_s10 + $0x60] sm:$0xff] %v806_v13  ;;  %v809_v17 = vmul.f32 %v1367_v27, %v1906_v32 }
 0x1a4   : > { %v1371_v20 = vpop.eup %1370  ;;  %854 = vst [vmem:[%s1843_s10 + $0xe0] sm:$0xff] %v822_v28  ;;  %v825_v15 = vmul.f32 %v1369_v16, %v1910_v46 }
 0x1a5   : > { %v1373_v23 = vpop.eup %1372  ;;  %841 = vst [vmem:[%s1843_s10 + $0x78] sm:$0xff] %v809_v17  ;;  %v807_v14 = vmul.f32 %v1371_v20, %v1915_v21 }
 0x1a6   : > { %857 = vst [vmem:[%s1843_s10 + $0xf8] sm:$0xff] %v825_v15  ;;  %v823_v31 = vmul.f32 %v1373_v23, %v1920_v60 }
 0x1a7   : > { %839 = vst [vmem:[%s1843_s10 + $0x68] sm:$0xff] %v807_v14 }
 0x1a8   : > { %855 = vst [vmem:[%s1843_s10 + $0xe8] sm:$0xff] %v823_v31 }
 0x1a9   : > { %1445 = shalt.err (!%p1442_p5)
}
 0x1aa   : > { %s1446_s29 = scalar_lea.hbm %s1965_s15, 4096  ;;  %s1450_s20 = scalar_lea.hbm %s2023_s3, 8192 }
 0x1ab   : > { %p1447_p9 = scmp.ne.s32.totalorder %s1965_s15, %s1446_s29  ;;  %p1451_p3 = scmp.lt.u32.totalorder %s1965_s15, %s2023_s3 }
 0x1ac   : > { %p1452_p7 = scmp.lt.u32.totalorder %s1450_s20, %s1446_s29  ;;  %p1454_p4 = scmp.lt.u32.totalorder %s1446_s29, %s1965_s15 }
 0x1ad   : > { %p1448_p1 = pnand %p1447_p9, %p1646_p10 }
 0x1ae   : > { %p1453_p13 = por %p1452_p7, %p1451_p3 }
 0x1af   : > { %p1449_p2 = pneg %p1448_p1 }
 0x1b0   : > { %p1455_p6 = por %p1454_p4, %p1453_p13 }
 0x1b2   : > { %p1456_p8 = pnand %p1455_p6, %p1449_p2 }
 0x1b4   : > { %1459 = shalt.err (!%p1456_p8)
}
 0x1b5   : > { %s1525_s10 = smov 128   ;;  %s1526_s11 = smov 8  }
 0x1b6   : > { %1151 = dma.vmem_to_hbm [thread:$0]  (%p1646_p10), %s1967_s9, 4096, %s1965_s15, %s859_s25, %s1525_s10, %s1525_s10, %s1526_s11  }
 0x1b7 PF: > { %s888_s18 = sand.u32 1, %s1498_s12   ;;  %p2041_p12 = scmp.ne.s32.totalorder %s2031_s23, 0 }
 0x1b8   : > { %p2042_p11 = scmp.ge.s32.totalorder %s1518_s17, 2  ;;  %s889_s19 = scalar_lea.sflag [#allocation4], %s888_s18 }
 0x1ba   : > { %p1162_p0 = pnand %p2042_p11, %p2041_p12 }
 0x1bc   : > { %1493 = dma.done.wait (!%p1162_p0), %s889_s19, 4096  }
 0x1bd   : > { %1495 = vsyncadd (!%p1162_p0), %s889_s19, 4294963200  ;;  %s20_s17 = sadd.s32 1, %s1518_s17   ;;  %s2043_s12 = smov %s1502_s13 }
 0x1be   : > { %p17_p5 = scmp.ge.s32.totalorder %s20_s17, 4   ;;  %s2044_s13 = smov %s1506_s14 }
 0x1bf   : > { %s2045_s14 = smov %s1655_s5  ;;  %s2046_s15 = smov %s1514_s16 }
 0x1c0   : > { %s2047_s16 = smov %s2049_s28  ;;  %19 = sbr.rel (!%p17_p5) target bundleno = 7 (0x7), region = 85 }
 0x1c7   :  { %894 = vsyncpa [#allocation3], 1 }
 0x1c8   :  { %896 = vsyncpa [#allocation3 + $0x1], 1 }
 0x1c9   :  { %897 = vsyncpa [#allocation6], 1 }
 0x1ca   :  { %898 = vsyncpa [#allocation4], 1 }
 0x1cb   :  { %900 = vsyncpa [#allocation4 + $0x1], 1 }

</bundles_post_ra>
